<compile_context>
chip_gen: v7x
topology: tpu7x:2x2x1
jax: 0.10.0
libtpu: 0.0.40
codegen_flags: <defaults>
</compile_context>

<pallas_src>
import jax
import jax.numpy as jnp
from jax import lax
from jax.experimental import pallas as pl
from jax.experimental.pallas import tpu as pltpu


def _mlp_kernel(x_ref, w_ref, b_ref, o_ref):
    # x_ref: (B, F)      activations
    # w_ref: (L, F, F)   PyTorch layout: (out_features, in_features)
    # b_ref: (L, 1, F)   biases, ready to broadcast over batch
    # o_ref: (B, F)      output
    n_layers = w_ref.shape[0]

    acc = x_ref[...]
    # Static (unrolled) layer loop: activation stays in registers, one MXU
    # matmul + bias add per layer. Contract on W's last dim => x @ W.T.
    for l in range(n_layers):
        w = w_ref[l]          # (F_out, F_in)
        b = b_ref[l]          # (1, F_out)
        acc = lax.dot_general(
            acc, w,
            dimension_numbers=(((1,), (1,)), ((), ())),
            preferred_element_type=jnp.float32,
        ) + b

    o_ref[...] = acc.astype(o_ref.dtype)


def mlp_forward(x, weights, biases):
    """Apply a stack of Linear layers: x -> L_{n-1}(...L_1(L_0(x))).

    Args:
      x:       (B, F) float32
      weights: (L, F, F) float32, PyTorch layout (out_features, in_features)
      biases:  (L, F) float32
    Returns:
      (B, F) float32
    """
    B, F = x.shape
    L = weights.shape[0]

    # Metadata-only reshape (no data movement) so the kernel can broadcast
    # the per-layer bias over the batch dim directly.
    b = biases.reshape(L, 1, F)

    return pl.pallas_call(
        _mlp_kernel,
        out_shape=jax.ShapeDtypeStruct((B, F), x.dtype),
        # Single grid step: every operand is one full-array VMEM block.
        in_specs=[
            pl.BlockSpec((B, F), lambda: (0, 0)),          # x
            pl.BlockSpec((L, F, F), lambda: (0, 0, 0)),    # all weights
            pl.BlockSpec((L, 1, F), lambda: (0, 0, 0)),    # all biases
        ],
        out_specs=pl.BlockSpec((B, F), lambda: (0, 0)),
    )(x, weights, b)


def init_params(key, n_features, n_layers):
    """Deterministic PyTorch-style init: U(-1/sqrt(F), 1/sqrt(F))."""
    bound = 1.0 / (n_features ** 0.5)
    kw, kb = jax.random.split(key)
    weights = jax.random.uniform(
        kw, (n_layers, n_features, n_features),
        minval=-bound, maxval=bound, dtype=jnp.float32)
    biases = jax.random.uniform(
        kb, (n_layers, n_features),
        minval=-bound, maxval=bound, dtype=jnp.float32)
    return weights, biases


if __name__ == "__main__":
    key = jax.random.PRNGKey(0)
    k_x, k_p = jax.random.split(key)

    batch = 8
    n_features = 32
    n_layers = 3

    x = jax.random.normal(k_x, (batch, n_features), dtype=jnp.float32)
    weights, biases = init_params(k_p, n_features, n_layers)

    out = mlp_forward(x, weights, biases)
    out = jax.block_until_ready(out)

    # Pure-JAX reference (same semantics as the PyTorch module).
    ref = x
    for l in range(n_layers):
        ref = ref @ weights[l].T + biases[l]

    assert out.shape == (batch, n_features)
    assert jnp.allclose(out, ref, atol=1e-5, rtol=1e-5)

    print("KERNEL_OK")
</pallas_src>

<mosaic_0001>
module attributes {stable_mosaic.version = 11 : i64} {
  func.func @_mlp_kernel(%arg0: memref<8x32xf32, #tpu.memory_space<vmem>>, %arg1: memref<3x32x32xf32, #tpu.memory_space<vmem>>, %arg2: memref<3x1x32xf32, #tpu.memory_space<vmem>>, %arg3: memref<8x32xf32, #tpu.memory_space<vmem>>) attributes {dimension_semantics = [], scalar_prefetch = 0 : i64, scratch_operands = 0 : i64, tpu.core_type = #tpu.core_type<tc>} {
    %c0 = arith.constant 0 : index
    %c0_0 = arith.constant 0 : index
    %0 = vector.load %arg0[%c0, %c0_0] : memref<8x32xf32, #tpu.memory_space<vmem>>, vector<8x32xf32>
    %c0_1 = arith.constant 0 : index
    %c0_2 = arith.constant 0 : index
    %c0_3 = arith.constant 0 : index
    %1 = vector.load %arg1[%c0_1, %c0_2, %c0_3] : memref<3x32x32xf32, #tpu.memory_space<vmem>>, vector<1x32x32xf32>
    %2 = vector.shape_cast %1 : vector<1x32x32xf32> to vector<32x32xf32>
    %c0_4 = arith.constant 0 : index
    %c0_5 = arith.constant 0 : index
    %c0_6 = arith.constant 0 : index
    %3 = vector.load %arg2[%c0_4, %c0_5, %c0_6] : memref<3x1x32xf32, #tpu.memory_space<vmem>>, vector<1x1x32xf32>
    %4 = vector.shape_cast %3 : vector<1x1x32xf32> to vector<1x32xf32>
    %cst = arith.constant dense<0.000000e+00> : vector<8x32xf32>
    %5 = tpu.matmul %0, %2, %cst {dimension_numbers = #tpu.dot_dimension_numbers<[1], [1], [0], [0], [0, 0, 1, 0], [], []>} : vector<8x32xf32>, vector<32x32xf32>, vector<8x32xf32> -> vector<8x32xf32>
    %6 = vector.broadcast %4 : vector<1x32xf32> to vector<8x32xf32>
    %7 = arith.addf %5, %6 : vector<8x32xf32>
    %c1 = arith.constant 1 : index
    %c0_7 = arith.constant 0 : index
    %c0_8 = arith.constant 0 : index
    %8 = vector.load %arg1[%c1, %c0_7, %c0_8] : memref<3x32x32xf32, #tpu.memory_space<vmem>>, vector<1x32x32xf32>
    %9 = vector.shape_cast %8 : vector<1x32x32xf32> to vector<32x32xf32>
    %c1_9 = arith.constant 1 : index
    %c0_10 = arith.constant 0 : index
    %c0_11 = arith.constant 0 : index
    %10 = vector.load %arg2[%c1_9, %c0_10, %c0_11] : memref<3x1x32xf32, #tpu.memory_space<vmem>>, vector<1x1x32xf32>
    %11 = vector.shape_cast %10 : vector<1x1x32xf32> to vector<1x32xf32>
    %cst_12 = arith.constant dense<0.000000e+00> : vector<8x32xf32>
    %12 = tpu.matmul %7, %9, %cst_12 {dimension_numbers = #tpu.dot_dimension_numbers<[1], [1], [0], [0], [0, 0, 1, 0], [], []>} : vector<8x32xf32>, vector<32x32xf32>, vector<8x32xf32> -> vector<8x32xf32>
    %13 = vector.broadcast %11 : vector<1x32xf32> to vector<8x32xf32>
    %14 = arith.addf %12, %13 : vector<8x32xf32>
    %c2 = arith.constant 2 : index
    %c0_13 = arith.constant 0 : index
    %c0_14 = arith.constant 0 : index
    %15 = vector.load %arg1[%c2, %c0_13, %c0_14] : memref<3x32x32xf32, #tpu.memory_space<vmem>>, vector<1x32x32xf32>
    %16 = vector.shape_cast %15 : vector<1x32x32xf32> to vector<32x32xf32>
    %c2_15 = arith.constant 2 : index
    %c0_16 = arith.constant 0 : index
    %c0_17 = arith.constant 0 : index
    %17 = vector.load %arg2[%c2_15, %c0_16, %c0_17] : memref<3x1x32xf32, #tpu.memory_space<vmem>>, vector<1x1x32xf32>
    %18 = vector.shape_cast %17 : vector<1x1x32xf32> to vector<1x32xf32>
    %cst_18 = arith.constant dense<0.000000e+00> : vector<8x32xf32>
    %19 = tpu.matmul %14, %16, %cst_18 {dimension_numbers = #tpu.dot_dimension_numbers<[1], [1], [0], [0], [0, 0, 1, 0], [], []>} : vector<8x32xf32>, vector<32x32xf32>, vector<8x32xf32> -> vector<8x32xf32>
    %20 = vector.broadcast %18 : vector<1x32xf32> to vector<8x32xf32>
    %21 = arith.addf %19, %20 : vector<8x32xf32>
    %c0_19 = arith.constant 0 : index
    %c0_20 = arith.constant 0 : index
    %22 = vector.load %arg3[%c0_19, %c0_20] : memref<8x32xf32, #tpu.memory_space<vmem>>, vector<8x32xf32>
    tpu.vector_store %arg3[%c0_19, %c0_20], %21 {strides = array<i32>} : memref<8x32xf32, #tpu.memory_space<vmem>>, vector<8x32xf32>,
    return
  }
}

</mosaic_0001>

<bundles_post_ra>
// kernel: tpu_custom_call.1
= control target key start
LH: loop header
LB: loop body
LE: loop exit
PB: predicated region body
PF: predicated region fallthrough
CT: control target
= control target key end

     0   :  { %8 = vsyncpa [#allocation3], 0  ;;  %s629_s0 = inlined_call_operand.hbm [shape: f32[8,32], index: 0, kind: input, shape index: {}]   ;;  %s630_s1 = inlined_call_operand.hbm [shape: f32[3,32,32], index: 1, kind: input, shape index: {}]   ;;  %s631_s2 = inlined_call_operand.vmem [shape: f32[3,1,32], index: 2, kind: input, shape index: {}]   ;;  %s632_s3 = inlined_call_operand.hbm [shape: f32[8,32], index: 3, kind: output, shape index: {}]  }
   0x1   :  { %9 = vsyncpa [#allocation6], 0 }
   0x2   :  { %10 = vsyncpa [#allocation4], 0  ;;  %s524_s12 = smov [#allocation2]   ;;  %s525_s14 = smov [#allocation5]  }
   0x3   :  { %s17_s13 = sshll.u32 %s524_s12, 4  ;;  %s26_s15 = sshll.u32 %s525_s14, 4  ;;  %s18_s13 = int_to_ptr.vmem [resolvable:$true] %s17_s13  ;;  %s552_s15 = int_to_ptr.vmem [resolvable:$true] %s26_s15 }
   0x4   :  { %s452_s18 = scalar_lea.hbm %s629_s0, 128 }
   0x5   :  { %p453_p0 = scmp.ne.s32.totalorder %s629_s0, %s452_s18  ;;  %p456_p1 = scmp.lt.u32.totalorder %s452_s18, %s629_s0 }
   0x7   :  { %p458_p2 = pnand %p456_p1, %p453_p0 }
   0x9   :  { %461 = shalt.err (!%p458_p2)
}
   0xa   :  { %s462_s23 = scalar_lea.vmem %s18_s13, 128  ;;  %p467_p4 = scmp.lt.s32.totalorder %s18_s13, %s18_s13 }
   0xb   :  { %p463_p3 = scmp.ne.s32.totalorder %s18_s13, %s462_s23  ;;  %p468_p5 = scmp.lt.s32.totalorder %s462_s23, %s462_s23 }
   0xd   :  { %p469_p6 = por %p468_p5, %p467_p4 }
   0xf   :  { %p470_p7 = pnand %p469_p6, %p463_p3 }
  0x11   :  { %473 = shalt.err (!%p470_p7)
}
  0x12   :  { %20 = dma.hbm_to_vmem [thread:$0]  %s629_s0, 128, %s18_s13, [#allocation3]  }
  0x13   :  { %s474_s28 = scalar_lea.hbm %s630_s1, 1536 }
  0x14   :  { %p475_p8 = scmp.ne.s32.totalorder %s630_s1, %s474_s28  ;;  %p478_p9 = scmp.lt.u32.totalorder %s474_s28, %s630_s1 }
  0x16   :  { %p480_p10 = pnand %p478_p9, %p475_p8 }
  0x18   :  { %483 = shalt.err (!%p480_p10)
}
  0x19   :  { %s484_s6 = scalar_lea.vmem %s552_s15, 1536  ;;  %p489_p12 = scmp.lt.s32.totalorder %s552_s15, %s552_s15 }
  0x1a   :  { %p485_p11 = scmp.ne.s32.totalorder %s552_s15, %s484_s6  ;;  %p490_p13 = scmp.lt.s32.totalorder %s484_s6, %s484_s6 }
  0x1c   :  { %p491_p0 = por %p490_p13, %p489_p12 }
  0x1e   :  { %p492_p1 = pnand %p491_p0, %p485_p11 }
  0x20   :  { %495 = shalt.err (!%p492_p1)
}
  0x21   :  { %s526_s0 = smov 128   ;;  %s527_s7 = smov 8  }
  0x22   :  { %32 = dma.hbm_to_vmem [thread:$0]  %s630_s1, 1536, %s552_s15, [#allocation6], %s526_s0, %s526_s0, %s527_s7  }
  0x23   :  { %518 = dma.done.wait [#allocation3], 128  }
  0x24   :  { %519 = vsyncadd [#allocation3], 4294967168 }
  0x25   :  { %520 = dma.done.wait [#allocation6], 1536  }
  0x26   :  { %521 = vsyncadd [#allocation6], 4294965760  ;;  %v528_v0 = vmov 0.0|0.0   ;;  %vm529_vm0 = vmmov 0   ;;  %v530_v1 = vmov 0.0   ;;  %vm53_vm1 = vcmask 261120  }
  0x27   :  { %420 = vmatprep.subr.bf16.mxu0 %v528_v0  ;;  %395 = vmatprep.mubr.msk.f32.mxu0 %vm529_vm0, %v530_v1  ;;  %v42_v2 = vld [vmem:[#allocation5] sm:$0xff]  ;;  %v43_v3 = vld [vmem:[#allocation5 + $0x8] sm:$0xff]  ;;  %vm587_vm2 = vmpackc.low %vm53_vm1, %vm53_vm1  ;;  %s531_s15 = smov [#allocation7]  }
  0x28   :  { %428 = vmatprep.subr.bf16.mxu1 %v528_v0  ;;  %406 = vmatprep.mubr.msk.f32.mxu1 %vm529_vm0, %v530_v1  ;;  %v421_v5 = vpack.c.bf16 %v43_v3, %v42_v2  ;;  %v140_v6 = vld [vmem:[#allocation5 + $0x20] sm:$0xff]  ;;  %v141_v7 = vld [vmem:[#allocation5 + $0x28] sm:$0xff]  ;;  %v44_v9 = vld [vmem:[#allocation5 + $0x10] sm:$0xff]  ;;  %s342_s16 = sshll.u32 %s531_s15, 4  ;;  %s343_s16 = int_to_ptr.vmem [resolvable:$true] %s342_s16 }
  0x29   :  { %v429_v8 = vpack.c.bf16 %v141_v7, %v140_v6  ;;  %v45_v10 = vld [vmem:[#allocation5 + $0x18] sm:$0xff]  ;;  %v142_v11 = vld [vmem:[#allocation5 + $0x30] sm:$0xff]  ;;  %v238_v16 = vld [vmem:[#allocation5 + $0x40] sm:$0xff]  ;;  %s496_s17 = scalar_lea.vmem %s343_s16, 128  ;;  %p501_p3 = scmp.lt.s32.totalorder %s343_s16, %s343_s16 }
  0x2a   :  { %423 = vmatpush3.bf16.xpose.msk.msra.mxu0 %vm587_vm2, %v421_v5  ;;  %v143_v12 = vld [vmem:[#allocation5 + $0x38] sm:$0xff]  ;;  %v425_v13 = vpack.c.bf16 %v45_v10, %v44_v9  ;;  %v239_v17 = vld [vmem:[#allocation5 + $0x48] sm:$0xff]  ;;  %v240_v19 = vld [vmem:[#allocation5 + $0x50] sm:$0xff]  ;;  %p497_p2 = scmp.ne.s32.totalorder %s343_s16, %s496_s17  ;;  %p502_p4 = scmp.lt.s32.totalorder %s496_s17, %s496_s17 }
  0x2b   :  { %424 = vmatprep.subr.bf16.mxu0 %v528_v0  ;;  %431 = vmatpush3.bf16.xpose.msk.msra.mxu1 %vm587_vm2, %v429_v8  ;;  %v433_v14 = vpack.c.bf16 %v143_v12, %v142_v11  ;;  %v41_v15 = vld [vmem:[#allocation2] sm:$0xff]  ;;  %v437_v18 = vpack.c.bf16 %v239_v17, %v238_v16 }
  0x2c   :  { %432 = vmatprep.subr.bf16.mxu1 %v528_v0  ;;  %v241_v20 = vld [vmem:[#allocation5 + $0x58] sm:$0xff]  ;;  %p503_p5 = por %p502_p4, %p501_p3 }
  0x2d   :  { %v441_v21 = vpack.c.bf16 %v241_v20, %v240_v19  ;;  %v352_v22 = vld [vmem:[%s631_s2] ss:$0 sm:$0xff]  ;;  %v359_v26 = vld [vmem:[%s631_s2 + $0x1] ss:$0 sm:$0xff]  ;;  %v366_v30 = vld [vmem:[%s631_s2 + $0x2] ss:$0 sm:$0xff] }
  0x2e   :  { %p504_p6 = pnand %p503_p5, %p497_p2 }
  0x32   :  { %427 = vmatpush3.bf16.xpose.msk.msra.mxu0 %vm587_vm2, %v425_v13 }
  0x33   :  { %436 = vmatprep.subr.bf16.mxu0 %v528_v0  ;;  %435 = vmatpush3.bf16.xpose.msk.msra.mxu1 %vm587_vm2, %v433_v14 }
  0x39   :  { %396 = vmatmul.mubr.msk.f32.vlgmr.msra.gmra.mrb[0].mxu0 %vm53_vm1, %v41_v15 }
  0x3a   :  { %417 = vmatprep.mubr.msk.f32.mxu0 %vm529_vm0, %v530_v1  ;;  %439 = vmatpush3.bf16.xpose.msk.msra.mxu0 %vm587_vm2, %v437_v18 }
  0x3b   :  { %440 = vmatprep.subr.bf16.mxu0 %v528_v0 }
  0x42   :  { %443 = vmatpush3.bf16.xpose.msk.msra.mxu0 %vm587_vm2, %v441_v21 }
 0x10c   :  { %v135_v23 = vpop.f32.mrb[0].mxu0 }
 0x10d   :  { %v136_v24 = vadd.f32 %v352_v22, %v135_v23  ;;  %v397_v25 = vpop.f32.mrb[1].mxu0 }
 0x10f   :  { %407 = vmatmul.mubr.msk.f32.vlgmr.msra.gmra.mrb[0].mxu1 %vm53_vm1, %v136_v24 }
 0x1e2   :  { %v233_v27 = vpop.f32.mrb[0].mxu1 }
 0x1e3   :  { %v234_v28 = vadd.f32 %v359_v26, %v233_v27  ;;  %v408_v29 = vpop.f32.mrb[1].mxu1 }
 0x1e5   :  { %418 = vmatmul.mubr.msk.f32.vlgmr.msra.gmra.mrb[2].mxu0 %vm53_vm1, %v234_v28 }
 0x2b8   :  { %v331_v31 = vpop.f32.mrb[2].mxu0 }
 0x2b9   :  { %v332_v32 = vadd.f32 %v366_v30, %v331_v31  ;;  %v419_v33 = vpop.f32.mrb[3].mxu0 }
 0x2bb   :  { %335 = vst.msk [vmem:[#allocation7] sm:$0xff] %vm53_vm1, %v332_v32 }
 0x2bc   :  { %507 = shalt.err (!%p504_p6)
}
 0x2bd   :  { %s508_s20 = scalar_lea.hbm %s632_s3, 128 }
 0x2be   :  { %p509_p7 = scmp.ne.s32.totalorder %s632_s3, %s508_s20  ;;  %p512_p8 = scmp.lt.u32.totalorder %s508_s20, %s632_s3 }
 0x2c0   :  { %p514_p9 = pnand %p512_p8, %p509_p7 }
 0x2c2   :  { %517 = shalt.err (!%p514_p9)
}
 0x2c3   :  { %345 = dma.vmem_to_hbm [thread:$0]  %s343_s16, 128, %s632_s3, [#allocation4]  }
 0x2c4   :  { %522 = dma.done.wait [#allocation4], 128  }
 0x2c5   :  { %523 = vsyncadd [#allocation4], 4294967168 }
 0x2c6   :  { %349 = vsyncpa [#allocation3], 1 }
 0x2c7   :  { %350 = vsyncpa [#allocation6], 1 }
 0x2c8   :  { %351 = vsyncpa [#allocation4], 1 }

</bundles_post_ra>
